<compile_context>
chip_gen: v7x
topology: tpu7x:2x2x1
jax: 0.10.0
libtpu: 0.0.40
codegen_flags: <defaults>
</compile_context>

<pallas_src>
import functools

import jax
import jax.numpy as jnp
from jax.experimental import pallas as pl
from jax.experimental.pallas import tpu as pltpu

LANE = 128
SUBLANE_BF16 = 16


def _round_up(x, m):
    return ((x + m - 1) // m) * m


def mlp_g_kernel(x_ref, w1_ref, b1_ref, w2_ref, b2_ref, out_ref):
    # fc1: bf16 operands, f32 accumulation; bias + activation math stays f32.
    h = jnp.dot(x_ref[...], w1_ref[...], preferred_element_type=jnp.float32) + b1_ref[...]
    h = jnp.where(h > 0, h, 0.2 * h)  # LeakyReLU(0.2)

    # fc2 (bf16 operands, f32 accumulate) + ReLU, then a single bf16 lane-dense store.
    y = jnp.dot(h.astype(w2_ref.dtype), w2_ref[...], preferred_element_type=jnp.float32)
    y = y + b2_ref[...]
    out_ref[...] = jnp.maximum(y, 0.0).astype(out_ref.dtype)


def prepare_params(w1, b1, w2, b2):
    """One-time prep (hoisted out of forward): lane-pad feature dims to 128 and
    pre-cast the matmul weights to bf16. Padded hidden columns have zero weight
    and zero bias, stay exactly 0 through LeakyReLU, and hit zero rows of the
    padded w2, so results are unchanged."""
    in_dim, hidden_dim = w1.shape
    latent_dim = w2.shape[1]
    hid_p = _round_up(hidden_dim, LANE)
    lat_p = _round_up(latent_dim, LANE)

    w1_p = jnp.zeros((in_dim, hid_p), jnp.float32).at[:, :hidden_dim].set(w1)
    b1_p = jnp.zeros((1, hid_p), jnp.float32).at[:, :hidden_dim].set(b1.reshape(1, -1))
    w2_p = jnp.zeros((hid_p, lat_p), jnp.float32).at[:hidden_dim, :latent_dim].set(w2)
    b2_p = jnp.zeros((1, lat_p), jnp.float32).at[:, :latent_dim].set(b2.reshape(1, -1))

    return dict(
        w1=w1_p.astype(jnp.bfloat16),  # [in_dim, hid_p]  bf16
        b1=b1_p,                       # [1, hid_p]       f32
        w2=w2_p.astype(jnp.bfloat16),  # [hid_p, lat_p]   bf16
        b2=b2_p,                       # [1, lat_p]       f32
        latent_dim=latent_dim,
    )


@functools.partial(jax.jit, static_argnames=("latent_dim", "block_rows"))
def _mlp_g_forward_padded(noise, att, w1, b1, w2, b2, *, latent_dim, block_rows=2048):
    B = noise.shape[0]
    in_dim, hid_p = w1.shape
    lat_p = w2.shape[1]
    assert in_dim == noise.shape[1] + att.shape[1]

    # One concatenated bf16 activation stream (single input DMA pipeline).
    x = jnp.concatenate([noise, att], axis=1).astype(jnp.bfloat16)

    # Batch tiling: tm must be a multiple of 16 (bf16 sublane packing); cap at
    # ceil(B/2) so large batches always produce >= 2 grid steps (v7x megacore).
    block_rows = max(_round_up(block_rows, SUBLANE_BF16), SUBLANE_BF16)
    tm = min(block_rows, max(_round_up(pl.cdiv(B, 2), SUBLANE_BF16), SUBLANE_BF16))
    B_pad = _round_up(B, tm)
    if B_pad != B:
        x = jnp.pad(x, ((0, B_pad - B), (0, 0)))

    grid = (B_pad // tm,)

    def row_spec(ncols):
        return pl.BlockSpec((tm, ncols), lambda i: (i, 0))

    def resident(shape):
        # Constant index_map: weights/biases DMA'd once and stay resident in VMEM.
        # NOTE: if hidden/latent widths ever grow large, add
        # pipeline_mode=pl.Buffered(1) here and set vmem_limit_bytes (v7x: 64 MiB).
        return pl.BlockSpec(shape, lambda i: (0, 0))

    flops = 2 * B_pad * (in_dim * hid_p + hid_p * lat_p)
    bytes_accessed = (
        B_pad * in_dim * 2              # bf16 activations in
        + B_pad * lat_p * 2             # bf16 output
        + (in_dim * hid_p + hid_p * lat_p) * 2  # bf16 weights
        + (hid_p + lat_p) * 4           # f32 biases
    )

    out = pl.pallas_call(
        mlp_g_kernel,
        out_shape=jax.ShapeDtypeStruct((B_pad, lat_p), jnp.bfloat16),
        grid=grid,
        in_specs=[
            row_spec(in_dim),
            resident(w1.shape),
            resident(b1.shape),
            resident(w2.shape),
            resident(b2.shape),
        ],
        out_specs=row_spec(lat_p),
        compiler_params=pltpu.CompilerParams(
            dimension_semantics=("parallel",),
        ),
        cost_estimate=pl.CostEstimate(
            flops=flops, transcendentals=0, bytes_accessed=bytes_accessed
        ),
    )(x, w1, b1, w2, b2)

    # Slice padded rows / lanes back to the logical result (bf16; upcast outside
    # only if a consumer needs f32).
    return out[:B, :latent_dim]


def mlp_g_forward(noise, att, params, *, block_rows=2048):
    return _mlp_g_forward_padded(
        noise, att,
        params["w1"], params["b1"], params["w2"], params["b2"],
        latent_dim=params["latent_dim"], block_rows=block_rows,
    )


def reference_forward(noise, att, w1, b1, w2, b2):
    # Pure f32 reference matching the PyTorch module semantics.
    x = jnp.concatenate([noise, att], axis=1)
    h = x @ w1 + b1
    h = jnp.where(h > 0, h, 0.2 * h)
    y = h @ w2 + b2
    return jnp.maximum(y, 0.0)


if __name__ == "__main__":
    # Small shapes implied by the module: noise [B, noise_dim], att [B, att_dim].
    B, noise_dim, att_dim, hidden_dim, latent_dim = 8, 16, 16, 32, 64

    key = jax.random.PRNGKey(0)
    k_noise, k_att, k1, k2 = jax.random.split(key, 4)

    noise = jax.random.normal(k_noise, (B, noise_dim), dtype=jnp.float32)
    att = jax.random.normal(k_att, (B, att_dim), dtype=jnp.float32)

    # weights_init: Linear weights ~ N(0, 0.02), biases = 0.
    in_dim = noise_dim + att_dim
    w1 = 0.02 * jax.random.normal(k1, (in_dim, hidden_dim), dtype=jnp.float32)
    b1 = jnp.zeros((hidden_dim,), dtype=jnp.float32)
    w2 = 0.02 * jax.random.normal(k2, (hidden_dim, latent_dim), dtype=jnp.float32)
    b2 = jnp.zeros((latent_dim,), dtype=jnp.float32)

    # One-time padding / bf16 casting (hoisted out of the per-call forward).
    params = prepare_params(w1, b1, w2, b2)

    out = mlp_g_forward(noise, att, params)
    out = jax.block_until_ready(out)

    ref = reference_forward(noise, att, w1, b1, w2, b2)
    assert out.shape == (B, latent_dim)
    assert out.dtype == jnp.bfloat16
    # Kernel uses bf16 matmul operands + bf16 output store (f32 accumulation);
    # compare against the f32 reference with a tolerance covering that rounding.
    out_f32 = out.astype(jnp.float32)
    err = float(jnp.max(jnp.abs(out_f32 - ref)))
    assert jnp.allclose(out_f32, ref, atol=5e-3, rtol=5e-2), err

    print("KERNEL_OK")
</pallas_src>

<mosaic_0001>
module attributes {stable_mosaic.version = 11 : i64} {
  func.func @mlp_g_kernel(%arg0: i32, %arg1: memref<16x32xbf16, #tpu.memory_space<vmem>>, %arg2: memref<32x128xbf16, #tpu.memory_space<vmem>>, %arg3: memref<1x128xf32, #tpu.memory_space<vmem>>, %arg4: memref<128x128xbf16, #tpu.memory_space<vmem>>, %arg5: memref<1x128xf32, #tpu.memory_space<vmem>>, %arg6: memref<16x128xbf16, #tpu.memory_space<vmem>>) attributes {dimension_semantics = [#tpu.dimension_semantics<parallel>], iteration_bounds = array<i64: 1>, scalar_prefetch = 0 : i64, scratch_operands = 0 : i64, tpu.core_type = #tpu.core_type<tc>, window_params = [{transform_indices = @transform_0, window_bounds = array<i64: 16, 32>}, {pipeline_mode = #tpu.pipeline_mode<synchronous>, transform_indices = @transform_1, window_bounds = array<i64: 32, 128>}, {pipeline_mode = #tpu.pipeline_mode<synchronous>, transform_indices = @transform_2, window_bounds = array<i64: 1, 128>}, {pipeline_mode = #tpu.pipeline_mode<synchronous>, transform_indices = @transform_3, window_bounds = array<i64: 128, 128>}, {pipeline_mode = #tpu.pipeline_mode<synchronous>, transform_indices = @transform_4, window_bounds = array<i64: 1, 128>}, {transform_indices = @transform_5, window_bounds = array<i64: 16, 128>}]} {
    %c0 = arith.constant 0 : index
    %c0_0 = arith.constant 0 : index
    %0 = vector.load %arg1[%c0, %c0_0] : memref<16x32xbf16, #tpu.memory_space<vmem>>, vector<16x32xbf16>
    %c0_1 = arith.constant 0 : index
    %c0_2 = arith.constant 0 : index
    %1 = vector.load %arg2[%c0_1, %c0_2] : memref<32x128xbf16, #tpu.memory_space<vmem>>, vector<32x128xbf16>
    %cst = arith.constant dense<0.000000e+00> : vector<16x128xf32>
    %2 = tpu.matmul %0, %1, %cst {dimension_numbers = #tpu.dot_dimension_numbers<[1], [0], [0], [1], [0, 0, 1, 1], [], []>} : vector<16x32xbf16>, vector<32x128xbf16>, vector<16x128xf32> -> vector<16x128xf32>
    %c0_3 = arith.constant 0 : index
    %c0_4 = arith.constant 0 : index
    %3 = vector.load %arg3[%c0_3, %c0_4] : memref<1x128xf32, #tpu.memory_space<vmem>>, vector<1x128xf32>
    %4 = vector.broadcast %3 : vector<1x128xf32> to vector<16x128xf32>
    %5 = arith.addf %2, %4 : vector<16x128xf32>
    %cst_5 = arith.constant 0.000000e+00 : f32
    %6 = vector.broadcast %cst_5 : f32 to vector<16x128xf32>
    %7 = arith.cmpf ogt, %5, %6 : vector<16x128xf32>
    %cst_6 = arith.constant 2.000000e-01 : f32
    %8 = vector.broadcast %cst_6 : f32 to vector<16x128xf32>
    %9 = arith.mulf %8, %5 : vector<16x128xf32>
    %10 = arith.select %7, %5, %9 : vector<16x128xi1>, vector<16x128xf32>
    %11 = arith.truncf %10 : vector<16x128xf32> to vector<16x128xbf16>
    %c0_7 = arith.constant 0 : index
    %c0_8 = arith.constant 0 : index
    %12 = vector.load %arg4[%c0_7, %c0_8] : memref<128x128xbf16, #tpu.memory_space<vmem>>, vector<128x128xbf16>
    %cst_9 = arith.constant dense<0.000000e+00> : vector<16x128xf32>
    %13 = tpu.matmul %11, %12, %cst_9 {dimension_numbers = #tpu.dot_dimension_numbers<[1], [0], [0], [1], [0, 0, 1, 1], [], []>} : vector<16x128xbf16>, vector<128x128xbf16>, vector<16x128xf32> -> vector<16x128xf32>
    %c0_10 = arith.constant 0 : index
    %c0_11 = arith.constant 0 : index
    %14 = vector.load %arg5[%c0_10, %c0_11] : memref<1x128xf32, #tpu.memory_space<vmem>>, vector<1x128xf32>
    %15 = vector.broadcast %14 : vector<1x128xf32> to vector<16x128xf32>
    %16 = arith.addf %13, %15 : vector<16x128xf32>
    %cst_12 = arith.constant 0.000000e+00 : f32
    %17 = vector.broadcast %cst_12 : f32 to vector<16x128xf32>
    %18 = arith.maximumf %16, %17 : vector<16x128xf32>
    %19 = arith.truncf %18 : vector<16x128xf32> to vector<16x128xbf16>
    %c0_13 = arith.constant 0 : index
    %c0_14 = arith.constant 0 : index
    %20 = vector.load %arg6[%c0_13, %c0_14] : memref<16x128xbf16, #tpu.memory_space<vmem>>, vector<16x128xbf16>
    tpu.vector_store %arg6[%c0_13, %c0_14], %19 {strides = array<i32>} : memref<16x128xbf16, #tpu.memory_space<vmem>>, vector<16x128xbf16>,
    return
  }
  func.func @transform_0(%arg0: i32) -> (i32, i32) {
    %c0_i32 = arith.constant 0 : i32
    %c0_i32_0 = arith.constant 0 : i32
    return %arg0, %c0_i32 : i32, i32
  }
  func.func @transform_1(%arg0: i32) -> (i32, i32) {
    %c0_i32 = arith.constant 0 : i32
    %c0_i32_0 = arith.constant 0 : i32
    %c0_i32_1 = arith.constant 0 : i32
    return %c0_i32, %c0_i32_0 : i32, i32
  }
  func.func @transform_2(%arg0: i32) -> (i32, i32) {
    %c0_i32 = arith.constant 0 : i32
    %c0_i32_0 = arith.constant 0 : i32
    %c0_i32_1 = arith.constant 0 : i32
    return %c0_i32, %c0_i32_0 : i32, i32
  }
  func.func @transform_3(%arg0: i32) -> (i32, i32) {
    %c0_i32 = arith.constant 0 : i32
    %c0_i32_0 = arith.constant 0 : i32
    %c0_i32_1 = arith.constant 0 : i32
    return %c0_i32, %c0_i32_0 : i32, i32
  }
  func.func @transform_4(%arg0: i32) -> (i32, i32) {
    %c0_i32 = arith.constant 0 : i32
    %c0_i32_0 = arith.constant 0 : i32
    %c0_i32_1 = arith.constant 0 : i32
    return %c0_i32, %c0_i32_0 : i32, i32
  }
  func.func @transform_5(%arg0: i32) -> (i32, i32) {
    %c0_i32 = arith.constant 0 : i32
    %c0_i32_0 = arith.constant 0 : i32
    return %arg0, %c0_i32 : i32, i32
  }
}

</mosaic_0001>

<bundles_post_ra>
// kernel: _mlp_g_forward_padded.1
= control target key start
LH: loop header
LB: loop body
LE: loop exit
PB: predicated region body
PF: predicated region fallthrough
CT: control target
= control target key end

     0   :  { %10 = vsyncpa [#allocation3], 0  ;;  %s349_s18 = smov [#allocation2]   ;;  %s414_s0 = inlined_call_operand.vmem [shape: bf16[16,32], index: 0, kind: input, shape index: {}]   ;;  %s415_s1 = inlined_call_operand.vmem [shape: bf16[32,128], index: 1, kind: input, shape index: {}]   ;;  %s416_s2 = inlined_call_operand.vmem [shape: f32[1,128], index: 2, kind: input, shape index: {}]   ;;  %s417_s3 = inlined_call_operand.hbm [shape: bf16[128,128], index: 3, kind: input, shape index: {}]   ;;  %s418_s4 = inlined_call_operand.vmem [shape: f32[1,128], index: 4, kind: input, shape index: {}]   ;;  %s419_s5 = inlined_call_operand.vmem [shape: bf16[16,128], index: 5, kind: output, shape index: {}]  }
   0x1   :  { %s22_s19 = sshll.u32 %s349_s18, 4  ;;  %s325_s22 = scalar_lea.hbm %s417_s3, 1024  ;;  %s23_s19 = int_to_ptr.vmem [resolvable:$true] %s22_s19 }
   0x2   :  { %p326_p0 = scmp.ne.s32.totalorder %s417_s3, %s325_s22  ;;  %p329_p1 = scmp.lt.u32.totalorder %s325_s22, %s417_s3 }
   0x4   :  { %p331_p2 = pnand %p329_p1, %p326_p0 }
   0x6   :  { %334 = shalt.err (!%p331_p2)
}
   0x7   :  { %s335_s27 = scalar_lea.vmem %s23_s19, 1024  ;;  %p340_p4 = scmp.lt.s32.totalorder %s23_s19, %s23_s19 }
   0x8   :  { %p336_p3 = scmp.ne.s32.totalorder %s23_s19, %s335_s27  ;;  %p341_p5 = scmp.lt.s32.totalorder %s335_s27, %s335_s27 }
   0xa   :  { %p342_p6 = por %p341_p5, %p340_p4 }
   0xc   :  { %p343_p7 = pnand %p342_p6, %p336_p3 }
   0xe   :  { %346 = shalt.err (!%p343_p7)
}
   0xf   :  { %s350_s28 = smov 64   ;;  %s351_s29 = smov 4  }
  0x10   :  { %28 = dma.hbm_to_vmem [thread:$0]  %s417_s3, 1024, %s23_s19, [#allocation3], %s350_s28, %s350_s28, %s351_s29  }
  0x11   :  { %347 = dma.done.wait [#allocation3], 1024  }
  0x12   :  { %348 = vsyncadd [#allocation3], 4294966272  ;;  %v352_v0 = vmov 0.0   ;;  %vm353_vm0 = vmmov 0   ;;  %v314_v1 = vld [vmem:[%s415_s1] sm:$0xff]   ;;  %v315_v2 = vld [vmem:[%s415_s1 + $0x8] sm:$0xff]  }
  0x13   :  { %281 = vmatprep.subr.bf16.mxu0 %v352_v0  ;;  %285 = vmatprep.mubr.msk.bf16.mxu0 %vm353_vm0, %v352_v0  ;;  %v317_v3 = vld [vmem:[#allocation2] sm:$0xff]   ;;  %v318_v5 = vld [vmem:[#allocation2 + $0x8] sm:$0xff]   ;;  %vm65_vm1 = vcmask 261120   ;;  %v319_v6 = vld [vmem:[#allocation2 + $0x10] sm:$0xff]  }
  0x14   :  { %289 = vmatprep.subr.bf16.mxu1 %v352_v0  ;;  %305 = vmatprep.mubr.msk.bf16.mxu1 %vm353_vm0, %v352_v0  ;;  %v316_v4 = vld [vmem:[%s414_s0] sm:$0xff]   ;;  %v320_v7 = vld [vmem:[#allocation2 + $0x18] sm:$0xff]   ;;  %v322_v9 = vld [vmem:[#allocation2 + $0x28] sm:$0xff]  }
  0x15   :  { %282 = vmatpush3.bf16.msra.mxu0 %v314_v1  ;;  %290 = vmatpush3.bf16.msra.mxu1 %v317_v3  ;;  %v321_v8 = vld [vmem:[#allocation2 + $0x20] sm:$0xff]   ;;  %v323_v10 = vld [vmem:[#allocation2 + $0x30] sm:$0xff]   ;;  %v324_v11 = vld [vmem:[#allocation2 + $0x38] sm:$0xff]  }
  0x16   :  { %283 = vmatprep.subr.bf16.mxu0 %v352_v0  ;;  %291 = vmatprep.subr.bf16.mxu1 %v352_v0  ;;  %v246_v12 = vld [vmem:[%s416_s2] ss:$0 sm:$0xff] }
  0x17   :  { %v251_v24 = vld [vmem:[%s418_s4] ss:$0 sm:$0xff] }
  0x19   :  { %284 = vmatpush3.bf16.msra.mxu0 %v315_v2  ;;  %292 = vmatpush3.bf16.msra.mxu1 %v318_v5 }
  0x1a   :  { %293 = vmatprep.subr.bf16.mxu1 %v352_v0 }
  0x1c   :  { %286 = vmatmul.mubr.msk.bf16.vlgmr.msra.gmra.mrb[0].mxu0 %vm65_vm1, %v316_v4 }
  0x1d   :  { %294 = vmatpush3.bf16.msra.mxu1 %v319_v6 }
  0x1e   :  { %295 = vmatprep.subr.bf16.mxu1 %v352_v0 }
  0x21   :  { %296 = vmatpush3.bf16.msra.mxu1 %v320_v7 }
  0x22   :  { %297 = vmatprep.subr.bf16.mxu1 %v352_v0 }
  0x25   :  { %298 = vmatpush3.bf16.msra.mxu1 %v321_v8 }
  0x26   :  { %299 = vmatprep.subr.bf16.mxu1 %v352_v0 }
  0x29   :  { %300 = vmatpush3.bf16.msra.mxu1 %v322_v9 }
  0x2a   :  { %301 = vmatprep.subr.bf16.mxu1 %v352_v0 }
  0x2d   :  { %302 = vmatpush3.bf16.msra.mxu1 %v323_v10 }
  0x2e   :  { %303 = vmatprep.subr.bf16.mxu1 %v352_v0 }
  0x31   :  { %304 = vmatpush3.bf16.msra.mxu1 %v324_v11 }
  0xef   :  { %v103_v13 = vpop.f32.mrb[0].mxu0 }
  0xf0   :  { %v104_v14 = vadd.f32 %v246_v12, %v103_v13  ;;  %v287_v15 = vpop.f32.mrb[1].mxu0 }
  0xf1   :  { %v106_v16 = vpop.f32.mrb[2].mxu0 }
  0xf2   :  { %v112_v17 = vmul.f32 0.2, %v104_v14  ;;  %v107_v18 = vadd.f32 %v246_v12, %v106_v16  ;;  %v288_v19 = vpop.f32.mrb[3].mxu0  ;;  %vm110_vm2 = vcmp.gt.f32.partialorder %v104_v14, 0.0 }
  0xf4   :  { %vm111_vm3 = vcmp.gt.f32.partialorder %v107_v18, 0.0  ;;  %v113_v20 = vmul.f32 0.2, %v107_v18  ;;  %v114_v21 = vsel %vm110_vm2, %v104_v14, %v112_v17 }
  0xf6   :  { %v115_v22 = vsel %vm111_vm3, %v107_v18, %v113_v20 }
  0xf7   :  { %v116_v23 = vpack.c.bf16 %v115_v22, %v114_v21 }
  0xf9   :  { %306 = vmatmul.mubr.bf16.vlgmr.msra.gmra.mrb[0].mxu1 %v116_v23 }
 0x1cc   :  { %v222_v25 = vpop.f32.mrb[0].mxu1 }
 0x1cd   :  { %v223_v26 = vadd.f32 %v251_v24, %v222_v25  ;;  %v307_v27 = vpop.f32.mrb[1].mxu1 }
 0x1ce   :  { %v225_v28 = vpop.f32.mrb[2].mxu1 }
 0x1cf   :  { %v226_v29 = vadd.f32 %v251_v24, %v225_v28  ;;  %v308_v30 = vpop.f32.mrb[3].mxu1  ;;  %v229_v31 = vmax.f32 %v223_v26, 0.0 }
 0x1d1   :  { %v230_v32 = vmax.f32 %v226_v29, 0.0 }
 0x1d3   :  { %v267_v33 = vpack.c.bf16 %v230_v32, %v229_v31 }
 0x1d5   :  { %268 = vst [vmem:[%s419_s5] sm:$0xff] %v267_v33  }
 0x1d6   :  { %245 = vsyncpa [#allocation3], 1 }

</bundles_post_ra>
